<compile_context>
chip_gen: v5e
topology: v5e:2x2
jax: 0.10.0
libtpu: 0.0.40
codegen_flags: <defaults>
</compile_context>

<pallas_src>
import functools

import jax
import jax.numpy as jnp
from jax.experimental import pallas as pl
from jax.experimental.pallas import tpu as pltpu


def _layernorm(x, gamma, beta, eps=1e-5):
    mu = jnp.mean(x, axis=-1, keepdims=True)
    xc = x - mu
    var = jnp.mean(xc * xc, axis=-1, keepdims=True)
    return xc * jax.lax.rsqrt(var + eps) * gamma + beta


def _transformer_block_kernel(
    v_ref, k_ref, q_ref,        # (H*N, S, D) head-major activations
    qres_ref,                   # (N*S, E) original query for the residual
    wv_t_ref, wk_t_ref, wq_t_ref,   # (D, D) pre-transposed head projections
    wo_t_ref,                   # (E, E) pre-transposed fc_out weight
    w1_t_ref, w2_t_ref,         # (E, F), (F, E) pre-transposed FFN weights
    vecs_ref,                   # (8, max(E,F)) packed biases / gammas / betas
    out_ref,                    # (N*S, E)
    *, heads, batch, seq, head_dim, embed_size, hidden,
):
    H, N, S, D, E, F = heads, batch, seq, head_dim, embed_size, hidden
    HN = H * N
    NS = N * S
    f32 = jnp.float32

    # packed small vectors (row layout fixed by the wrapper)
    bo  = vecs_ref[0:1, 0:E]
    g1  = vecs_ref[1:2, 0:E]
    b1  = vecs_ref[2:3, 0:E]
    bw2 = vecs_ref[3:4, 0:E]
    g2  = vecs_ref[4:5, 0:E]
    b2  = vecs_ref[5:6, 0:E]
    bw1 = vecs_ref[6:7, 0:F]

    inv_scale = 1.0 / (E ** 0.5)   # module uses embed_size, not head_dim

    # ---- fused per-head projections: one (H*N*S, D) @ (D, D) matmul each ----
    q2 = q_ref[...].reshape(HN * S, D)
    k2 = k_ref[...].reshape(HN * S, D)
    v2 = v_ref[...].reshape(HN * S, D)

    qp = jnp.dot(q2, wq_t_ref[...], preferred_element_type=f32) * inv_scale
    kp = jnp.dot(k2, wk_t_ref[...], preferred_element_type=f32)
    vp = jnp.dot(v2, wv_t_ref[...], preferred_element_type=f32)

    qp3 = qp.reshape(HN, S, D)
    kp3 = kp.reshape(HN, S, D)
    vp3 = vp.reshape(HN, S, D)

    # ---- attention (batched over the H*N head/batch pairs) ----
    energy = jnp.einsum('bqd,bkd->bqk', qp3, kp3,
                        preferred_element_type=f32)           # (HN, S, S)
    m = jnp.max(energy, axis=-1, keepdims=True)
    p = jnp.exp(energy - m)
    denom = jnp.sum(p, axis=-1, keepdims=True)
    att = p * pl.reciprocal(denom, approx=False)               # softmax over keys
    head_out = jnp.einsum('bqk,bkd->bqd', att, vp3,
                          preferred_element_type=f32)          # (HN, S, D)

    # ---- fc_out: accumulate per-head contributions (no concat / lane shuffles) ----
    wo_t = wo_t_ref[...]
    attn = jnp.zeros((NS, E), f32)
    for h in range(H):
        ho = head_out[h * N:(h + 1) * N].reshape(NS, D)        # contiguous head slab
        attn = attn + jnp.dot(ho, wo_t[h * D:(h + 1) * D, :],
                              preferred_element_type=f32)
    attn = attn + bo

    # ---- residual + norm1 (dropout = identity in eval mode) ----
    x = _layernorm(attn + qres_ref[...], g1, b1)               # (NS, E)

    # ---- feed-forward ----
    h1 = jnp.dot(x, w1_t_ref[...], preferred_element_type=f32) + bw1
    h1 = jnp.maximum(h1, 0.0)                                  # ReLU
    ff = jnp.dot(h1, w2_t_ref[...], preferred_element_type=f32) + bw2

    # ---- residual + norm2 ----
    out_ref[...] = _layernorm(ff + x, g2, b2).astype(out_ref.dtype)


def transformer_block(value, key, query, params, heads):
    N, S, E = query.shape
    H = heads
    D = E // H
    F = params["w1"].shape[0]          # forward_expansion * E
    W = max(E, F)

    # pre-transpose weights so the kernel does x @ W.T directly
    wv_t = params["wv"].T
    wk_t = params["wk"].T
    wq_t = params["wq"].T
    wo_t = params["wo"].T
    w1_t = params["w1"].T
    w2_t = params["w2"].T

    # pack the 7 small vectors into one (8, max(E,F)) array (single DMA / one vreg tile)
    def _row(v):
        return jnp.pad(v.astype(jnp.float32), (0, W - v.shape[0]))
    vecs = jnp.stack([
        _row(params["bo"]), _row(params["g1"]), _row(params["b1"]),
        _row(params["bw2"]), _row(params["g2"]), _row(params["b2"]),
        _row(params["bw1"]), jnp.zeros((W,), jnp.float32),
    ])

    # head-major activation layout: (N,S,E) -> (H*N, S, D), so each head's
    # (N*S, D) slab is contiguous for the fc_out accumulation.
    def _split_heads(x):
        return x.reshape(N, S, H, D).transpose(2, 0, 1, 3).reshape(H * N, S, D)

    vh = _split_heads(value)
    kh = _split_heads(key)
    qh = _split_heads(query)
    q_res = query.reshape(N * S, E)

    kernel = functools.partial(
        _transformer_block_kernel,
        heads=H, batch=N, seq=S, head_dim=D, embed_size=E, hidden=F)

    vmem = pl.BlockSpec(memory_space=pltpu.MemorySpace.VMEM)

    out2d = pl.pallas_call(
        kernel,
        out_shape=jax.ShapeDtypeStruct((N * S, E), jnp.float32),
        in_specs=[vmem] * 11,
        out_specs=vmem,
    )(vh, kh, qh, q_res, wv_t, wk_t, wq_t, wo_t, w1_t, w2_t, vecs)

    return out2d.reshape(N, S, E)


def _reference(value, key, query, params, heads):
    """Pure-JAX reference mirroring the PyTorch forward (eval mode, mask=None)."""
    N, S, E = query.shape
    D = E // heads
    v = value.reshape(N, S, heads, D) @ params["wv"].T
    k = key.reshape(N, S, heads, D) @ params["wk"].T
    q = query.reshape(N, S, heads, D) @ params["wq"].T
    energy = jnp.einsum("nqhd,nkhd->nhqk", q, k)
    att = jax.nn.softmax(energy / (E ** 0.5), axis=3)
    out = jnp.einsum("nhql,nlhd->nqhd", att, v).reshape(N, S, E)
    attention = out @ params["wo"].T + params["bo"]

    def ln(x, g, b, eps=1e-5):
        mu = jnp.mean(x, axis=-1, keepdims=True)
        var = jnp.mean((x - mu) ** 2, axis=-1, keepdims=True)
        return (x - mu) / jnp.sqrt(var + eps) * g + b

    x = ln(attention + query, params["g1"], params["b1"])
    h = jnp.maximum(x @ params["w1"].T + params["bw1"], 0.0)
    ff = h @ params["w2"].T + params["bw2"]
    return ln(ff + x, params["g2"], params["b2"])


if __name__ == "__main__":
    # module hyperparameters
    embed_size = 32
    heads = 4
    forward_expansion = 4
    N, S = 2, 8
    D = embed_size // heads
    F = forward_expansion * embed_size

    root = jax.random.PRNGKey(0)
    ks = jax.random.split(root, 16)

    def init(k, shape, scale=0.1):
        return (scale * jax.random.normal(k, shape)).astype(jnp.float32)

    params = {
        "wv": init(ks[0], (D, D)),
        "wk": init(ks[1], (D, D)),
        "wq": init(ks[2], (D, D)),
        "wo": init(ks[3], (embed_size, embed_size)),
        "bo": init(ks[4], (embed_size,)),
        "g1": jnp.ones((embed_size,), jnp.float32),
        "b1": jnp.zeros((embed_size,), jnp.float32),
        "w1": init(ks[5], (F, embed_size)),
        "bw1": init(ks[6], (F,)),
        "w2": init(ks[7], (embed_size, F)),
        "bw2": init(ks[8], (embed_size,)),
        "g2": jnp.ones((embed_size,), jnp.float32),
        "b2": jnp.zeros((embed_size,), jnp.float32),
    }

    value = init(ks[9], (N, S, embed_size), scale=1.0)
    key = init(ks[10], (N, S, embed_size), scale=1.0)
    query = init(ks[11], (N, S, embed_size), scale=1.0)

    out = transformer_block(value, key, query, params, heads)
    out = jax.block_until_ready(out)

    ref = _reference(value, key, query, params, heads)
    assert out.shape == (N, S, embed_size)
    assert jnp.allclose(out, ref, atol=1e-4, rtol=1e-4), "mismatch vs reference"

    print("KERNEL_OK")
</pallas_src>

<mosaic_0001>
module attributes {stable_mosaic.version = 11 : i64} {
  func.func @_transformer_block_kernel(%arg0: memref<8x8x8xf32, #tpu.memory_space<vmem>>, %arg1: memref<8x8x8xf32, #tpu.memory_space<vmem>>, %arg2: memref<8x8x8xf32, #tpu.memory_space<vmem>>, %arg3: memref<16x32xf32, #tpu.memory_space<vmem>>, %arg4: memref<8x8xf32, #tpu.memory_space<vmem>>, %arg5: memref<8x8xf32, #tpu.memory_space<vmem>>, %arg6: memref<8x8xf32, #tpu.memory_space<vmem>>, %arg7: memref<32x32xf32, #tpu.memory_space<vmem>>, %arg8: memref<32x128xf32, #tpu.memory_space<vmem>>, %arg9: memref<128x32xf32, #tpu.memory_space<vmem>>, %arg10: memref<8x128xf32, #tpu.memory_space<vmem>>, %arg11: memref<16x32xf32, #tpu.memory_space<vmem>>) attributes {dimension_semantics = [], scalar_prefetch = 0 : i64, scratch_operands = 0 : i64, tpu.core_type = #tpu.core_type<tc>} {
    %c0 = arith.constant 0 : index
    %c0_0 = arith.constant 0 : index
    %0 = vector.load %arg10[%c0, %c0_0] : memref<8x128xf32, #tpu.memory_space<vmem>>, vector<1x32xf32>
    %c1 = arith.constant 1 : index
    %c0_1 = arith.constant 0 : index
    %1 = vector.load %arg10[%c1, %c0_1] : memref<8x128xf32, #tpu.memory_space<vmem>>, vector<1x32xf32>
    %c2 = arith.constant 2 : index
    %c0_2 = arith.constant 0 : index
    %2 = vector.load %arg10[%c2, %c0_2] : memref<8x128xf32, #tpu.memory_space<vmem>>, vector<1x32xf32>
    %c3 = arith.constant 3 : index
    %c0_3 = arith.constant 0 : index
    %3 = vector.load %arg10[%c3, %c0_3] : memref<8x128xf32, #tpu.memory_space<vmem>>, vector<1x32xf32>
    %c4 = arith.constant 4 : index
    %c0_4 = arith.constant 0 : index
    %4 = vector.load %arg10[%c4, %c0_4] : memref<8x128xf32, #tpu.memory_space<vmem>>, vector<1x32xf32>
    %c5 = arith.constant 5 : index
    %c0_5 = arith.constant 0 : index
    %5 = vector.load %arg10[%c5, %c0_5] : memref<8x128xf32, #tpu.memory_space<vmem>>, vector<1x32xf32>
    %c6 = arith.constant 6 : index
    %c0_6 = arith.constant 0 : index
    %6 = vector.load %arg10[%c6, %c0_6] : memref<8x128xf32, #tpu.memory_space<vmem>>, vector<1x128xf32>
    %c0_7 = arith.constant 0 : index
    %c0_8 = arith.constant 0 : index
    %c0_9 = arith.constant 0 : index
    %7 = vector.load %arg2[%c0_7, %c0_8, %c0_9] : memref<8x8x8xf32, #tpu.memory_space<vmem>>, vector<8x8x8xf32>
    %8 = vector.shape_cast %7 : vector<8x8x8xf32> to vector<64x8xf32>
    %c0_10 = arith.constant 0 : index
    %c0_11 = arith.constant 0 : index
    %c0_12 = arith.constant 0 : index
    %9 = vector.load %arg1[%c0_10, %c0_11, %c0_12] : memref<8x8x8xf32, #tpu.memory_space<vmem>>, vector<8x8x8xf32>
    %10 = vector.shape_cast %9 : vector<8x8x8xf32> to vector<64x8xf32>
    %c0_13 = arith.constant 0 : index
    %c0_14 = arith.constant 0 : index
    %c0_15 = arith.constant 0 : index
    %11 = vector.load %arg0[%c0_13, %c0_14, %c0_15] : memref<8x8x8xf32, #tpu.memory_space<vmem>>, vector<8x8x8xf32>
    %12 = vector.shape_cast %11 : vector<8x8x8xf32> to vector<64x8xf32>
    %c0_16 = arith.constant 0 : index
    %c0_17 = arith.constant 0 : index
    %13 = vector.load %arg6[%c0_16, %c0_17] : memref<8x8xf32, #tpu.memory_space<vmem>>, vector<8x8xf32>
    %cst = arith.constant dense<0.000000e+00> : vector<64x8xf32>
    %14 = tpu.matmul %8, %13, %cst {dimension_numbers = #tpu.dot_dimension_numbers<[1], [0], [0], [1], [0, 0, 1, 1], [], []>} : vector<64x8xf32>, vector<8x8xf32>, vector<64x8xf32> -> vector<64x8xf32>
    %cst_18 = arith.constant 0.176776692 : f32
    %15 = vector.broadcast %cst_18 : f32 to vector<64x8xf32>
    %16 = arith.mulf %14, %15 : vector<64x8xf32>
    %c0_19 = arith.constant 0 : index
    %c0_20 = arith.constant 0 : index
    %17 = vector.load %arg5[%c0_19, %c0_20] : memref<8x8xf32, #tpu.memory_space<vmem>>, vector<8x8xf32>
    %cst_21 = arith.constant dense<0.000000e+00> : vector<64x8xf32>
    %18 = tpu.matmul %10, %17, %cst_21 {dimension_numbers = #tpu.dot_dimension_numbers<[1], [0], [0], [1], [0, 0, 1, 1], [], []>} : vector<64x8xf32>, vector<8x8xf32>, vector<64x8xf32> -> vector<64x8xf32>
    %c0_22 = arith.constant 0 : index
    %c0_23 = arith.constant 0 : index
    %19 = vector.load %arg4[%c0_22, %c0_23] : memref<8x8xf32, #tpu.memory_space<vmem>>, vector<8x8xf32>
    %cst_24 = arith.constant dense<0.000000e+00> : vector<64x8xf32>
    %20 = tpu.matmul %12, %19, %cst_24 {dimension_numbers = #tpu.dot_dimension_numbers<[1], [0], [0], [1], [0, 0, 1, 1], [], []>} : vector<64x8xf32>, vector<8x8xf32>, vector<64x8xf32> -> vector<64x8xf32>
    %21 = vector.shape_cast %16 : vector<64x8xf32> to vector<8x8x8xf32>
    %22 = vector.shape_cast %18 : vector<64x8xf32> to vector<8x8x8xf32>
    %23 = vector.shape_cast %20 : vector<64x8xf32> to vector<8x8x8xf32>
    "tpu.trace_start"() <{level = 10 : i32, message = "bqd,bkd->bqk"}> : () -> ()
    %cst_25 = arith.constant dense<0.000000e+00> : vector<8x8x8xf32>
    %24 = tpu.matmul %21, %22, %cst_25 {dimension_numbers = #tpu.dot_dimension_numbers<[2], [2], [1], [1], [0, 0, 0, 1, 1, 1], [0], [0]>} : vector<8x8x8xf32>, vector<8x8x8xf32>, vector<8x8x8xf32> -> vector<8x8x8xf32>
    "tpu.trace_stop"() : () -> ()
    %cst_26 = arith.constant dense<0xFF800000> : vector<8x8xf32>
    %25 = vector.multi_reduction <maximumf>, %24, %cst_26 [2] : vector<8x8x8xf32> to vector<8x8xf32>
    %26 = vector.shape_cast %25 : vector<8x8xf32> to vector<8x8x1xf32>
    %27 = vector.broadcast %26 : vector<8x8x1xf32> to vector<8x8x8xf32>
    %28 = arith.subf %24, %27 : vector<8x8x8xf32>
    %29 = math.exp %28 : vector<8x8x8xf32>
    %cst_27 = arith.constant dense<0.000000e+00> : vector<8x8xf32>
    %30 = vector.multi_reduction <add>, %29, %cst_27 [2] : vector<8x8x8xf32> to vector<8x8xf32>
    %31 = vector.shape_cast %30 : vector<8x8xf32> to vector<8x8x1xf32>
    %32 = tpu.reciprocal %31 : vector<8x8x1xf32> -> vector<8x8x1xf32>
    %33 = vector.broadcast %32 : vector<8x8x1xf32> to vector<8x8x8xf32>
    %34 = arith.mulf %29, %33 : vector<8x8x8xf32>
    "tpu.trace_start"() <{level = 10 : i32, message = "bqk,bkd->bqd"}> : () -> ()
    %cst_28 = arith.constant dense<0.000000e+00> : vector<8x8x8xf32>
    %35 = tpu.matmul %34, %23, %cst_28 {dimension_numbers = #tpu.dot_dimension_numbers<[2], [1], [1], [2], [0, 0, 0, 1, 1, 2], [0], [0]>} : vector<8x8x8xf32>, vector<8x8x8xf32>, vector<8x8x8xf32> -> vector<8x8x8xf32>
    "tpu.trace_stop"() : () -> ()
    %c0_29 = arith.constant 0 : index
    %c0_30 = arith.constant 0 : index
    %36 = vector.load %arg7[%c0_29, %c0_30] : memref<32x32xf32, #tpu.memory_space<vmem>>, vector<32x32xf32>
    %cst_31 = arith.constant 0.000000e+00 : f32
    %37 = vector.broadcast %cst_31 : f32 to vector<16x32xf32>
    %38 = vector.extract_strided_slice %35 {offsets = [0, 0, 0], sizes = [2, 8, 8], strides = [1, 1, 1]} : vector<8x8x8xf32> to vector<2x8x8xf32>
    %39 = vector.shape_cast %38 : vector<2x8x8xf32> to vector<16x8xf32>
    %40 = vector.extract_strided_slice %36 {offsets = [0, 0], sizes = [8, 32], strides = [1, 1]} : vector<32x32xf32> to vector<8x32xf32>
    %cst_32 = arith.constant dense<0.000000e+00> : vector<16x32xf32>
    %41 = tpu.matmul %39, %40, %cst_32 {dimension_numbers = #tpu.dot_dimension_numbers<[1], [0], [0], [1], [0, 0, 1, 1], [], []>} : vector<16x8xf32>, vector<8x32xf32>, vector<16x32xf32> -> vector<16x32xf32>
    %42 = arith.addf %37, %41 : vector<16x32xf32>
    %43 = vector.extract_strided_slice %35 {offsets = [2, 0, 0], sizes = [2, 8, 8], strides = [1, 1, 1]} : vector<8x8x8xf32> to vector<2x8x8xf32>
    %44 = vector.shape_cast %43 : vector<2x8x8xf32> to vector<16x8xf32>
    %45 = vector.extract_strided_slice %36 {offsets = [8, 0], sizes = [8, 32], strides = [1, 1]} : vector<32x32xf32> to vector<8x32xf32>
    %cst_33 = arith.constant dense<0.000000e+00> : vector<16x32xf32>
    %46 = tpu.matmul %44, %45, %cst_33 {dimension_numbers = #tpu.dot_dimension_numbers<[1], [0], [0], [1], [0, 0, 1, 1], [], []>} : vector<16x8xf32>, vector<8x32xf32>, vector<16x32xf32> -> vector<16x32xf32>
    %47 = arith.addf %42, %46 : vector<16x32xf32>
    %48 = vector.extract_strided_slice %35 {offsets = [4, 0, 0], sizes = [2, 8, 8], strides = [1, 1, 1]} : vector<8x8x8xf32> to vector<2x8x8xf32>
    %49 = vector.shape_cast %48 : vector<2x8x8xf32> to vector<16x8xf32>
    %50 = vector.extract_strided_slice %36 {offsets = [16, 0], sizes = [8, 32], strides = [1, 1]} : vector<32x32xf32> to vector<8x32xf32>
    %cst_34 = arith.constant dense<0.000000e+00> : vector<16x32xf32>
    %51 = tpu.matmul %49, %50, %cst_34 {dimension_numbers = #tpu.dot_dimension_numbers<[1], [0], [0], [1], [0, 0, 1, 1], [], []>} : vector<16x8xf32>, vector<8x32xf32>, vector<16x32xf32> -> vector<16x32xf32>
    %52 = arith.addf %47, %51 : vector<16x32xf32>
    %53 = vector.extract_strided_slice %35 {offsets = [6, 0, 0], sizes = [2, 8, 8], strides = [1, 1, 1]} : vector<8x8x8xf32> to vector<2x8x8xf32>
    %54 = vector.shape_cast %53 : vector<2x8x8xf32> to vector<16x8xf32>
    %55 = vector.extract_strided_slice %36 {offsets = [24, 0], sizes = [8, 32], strides = [1, 1]} : vector<32x32xf32> to vector<8x32xf32>
    %cst_35 = arith.constant dense<0.000000e+00> : vector<16x32xf32>
    %56 = tpu.matmul %54, %55, %cst_35 {dimension_numbers = #tpu.dot_dimension_numbers<[1], [0], [0], [1], [0, 0, 1, 1], [], []>} : vector<16x8xf32>, vector<8x32xf32>, vector<16x32xf32> -> vector<16x32xf32>
    %57 = arith.addf %52, %56 : vector<16x32xf32>
    %58 = vector.broadcast %0 : vector<1x32xf32> to vector<16x32xf32>
    %59 = arith.addf %57, %58 : vector<16x32xf32>
    %c0_36 = arith.constant 0 : index
    %c0_37 = arith.constant 0 : index
    %60 = vector.load %arg3[%c0_36, %c0_37] : memref<16x32xf32, #tpu.memory_space<vmem>>, vector<16x32xf32>
    %61 = arith.addf %59, %60 : vector<16x32xf32>
    %cst_38 = arith.constant dense<0.000000e+00> : vector<16xf32>
    %62 = vector.multi_reduction <add>, %61, %cst_38 [1] : vector<16x32xf32> to vector<16xf32>
    %63 = vector.shape_cast %62 : vector<16xf32> to vector<16x1xf32>
    %cst_39 = arith.constant 3.200000e+01 : f32
    %64 = vector.broadcast %cst_39 : f32 to vector<16x1xf32>
    %65 = arith.divf %63, %64 : vector<16x1xf32>
    %66 = vector.broadcast %65 : vector<16x1xf32> to vector<16x32xf32>
    %67 = arith.subf %61, %66 : vector<16x32xf32>
    %68 = arith.mulf %67, %67 : vector<16x32xf32>
    %cst_40 = arith.constant dense<0.000000e+00> : vector<16xf32>
    %69 = vector.multi_reduction <add>, %68, %cst_40 [1] : vector<16x32xf32> to vector<16xf32>
    %70 = vector.shape_cast %69 : vector<16xf32> to vector<16x1xf32>
    %cst_41 = arith.constant 3.200000e+01 : f32
    %71 = vector.broadcast %cst_41 : f32 to vector<16x1xf32>
    %72 = arith.divf %70, %71 : vector<16x1xf32>
    %cst_42 = arith.constant 9.99999974E-6 : f32
    %73 = vector.broadcast %cst_42 : f32 to vector<16x1xf32>
    %74 = arith.addf %72, %73 : vector<16x1xf32>
    %75 = math.rsqrt %74 : vector<16x1xf32>
    %76 = vector.broadcast %75 : vector<16x1xf32> to vector<16x32xf32>
    %77 = arith.mulf %67, %76 : vector<16x32xf32>
    %78 = vector.broadcast %1 : vector<1x32xf32> to vector<16x32xf32>
    %79 = arith.mulf %77, %78 : vector<16x32xf32>
    %80 = vector.broadcast %2 : vector<1x32xf32> to vector<16x32xf32>
    %81 = arith.addf %79, %80 : vector<16x32xf32>
    %c0_43 = arith.constant 0 : index
    %c0_44 = arith.constant 0 : index
    %82 = vector.load %arg8[%c0_43, %c0_44] : memref<32x128xf32, #tpu.memory_space<vmem>>, vector<32x128xf32>
    %cst_45 = arith.constant dense<0.000000e+00> : vector<16x128xf32>
    %83 = tpu.matmul %81, %82, %cst_45 {dimension_numbers = #tpu.dot_dimension_numbers<[1], [0], [0], [1], [0, 0, 1, 1], [], []>} : vector<16x32xf32>, vector<32x128xf32>, vector<16x128xf32> -> vector<16x128xf32>
    %84 = vector.broadcast %6 : vector<1x128xf32> to vector<16x128xf32>
    %85 = arith.addf %83, %84 : vector<16x128xf32>
    %cst_46 = arith.constant 0.000000e+00 : f32
    %86 = vector.broadcast %cst_46 : f32 to vector<16x128xf32>
    %87 = arith.maximumf %85, %86 : vector<16x128xf32>
    %c0_47 = arith.constant 0 : index
    %c0_48 = arith.constant 0 : index
    %88 = vector.load %arg9[%c0_47, %c0_48] : memref<128x32xf32, #tpu.memory_space<vmem>>, vector<128x32xf32>
    %cst_49 = arith.constant dense<0.000000e+00> : vector<16x32xf32>
    %89 = tpu.matmul %87, %88, %cst_49 {dimension_numbers = #tpu.dot_dimension_numbers<[1], [0], [0], [1], [0, 0, 1, 1], [], []>} : vector<16x128xf32>, vector<128x32xf32>, vector<16x32xf32> -> vector<16x32xf32>
    %90 = vector.broadcast %3 : vector<1x32xf32> to vector<16x32xf32>
    %91 = arith.addf %89, %90 : vector<16x32xf32>
    %92 = arith.addf %91, %81 : vector<16x32xf32>
    %cst_50 = arith.constant dense<0.000000e+00> : vector<16xf32>
    %93 = vector.multi_reduction <add>, %92, %cst_50 [1] : vector<16x32xf32> to vector<16xf32>
    %94 = vector.shape_cast %93 : vector<16xf32> to vector<16x1xf32>
    %cst_51 = arith.constant 3.200000e+01 : f32
    %95 = vector.broadcast %cst_51 : f32 to vector<16x1xf32>
    %96 = arith.divf %94, %95 : vector<16x1xf32>
    %97 = vector.broadcast %96 : vector<16x1xf32> to vector<16x32xf32>
    %98 = arith.subf %92, %97 : vector<16x32xf32>
    %99 = arith.mulf %98, %98 : vector<16x32xf32>
    %cst_52 = arith.constant dense<0.000000e+00> : vector<16xf32>
    %100 = vector.multi_reduction <add>, %99, %cst_52 [1] : vector<16x32xf32> to vector<16xf32>
    %101 = vector.shape_cast %100 : vector<16xf32> to vector<16x1xf32>
    %cst_53 = arith.constant 3.200000e+01 : f32
    %102 = vector.broadcast %cst_53 : f32 to vector<16x1xf32>
    %103 = arith.divf %101, %102 : vector<16x1xf32>
    %cst_54 = arith.constant 9.99999974E-6 : f32
    %104 = vector.broadcast %cst_54 : f32 to vector<16x1xf32>
    %105 = arith.addf %103, %104 : vector<16x1xf32>
    %106 = math.rsqrt %105 : vector<16x1xf32>
    %107 = vector.broadcast %106 : vector<16x1xf32> to vector<16x32xf32>
    %108 = arith.mulf %98, %107 : vector<16x32xf32>
    %109 = vector.broadcast %4 : vector<1x32xf32> to vector<16x32xf32>
    %110 = arith.mulf %108, %109 : vector<16x32xf32>
    %111 = vector.broadcast %5 : vector<1x32xf32> to vector<16x32xf32>
    %112 = arith.addf %110, %111 : vector<16x32xf32>
    %c0_55 = arith.constant 0 : index
    %c0_56 = arith.constant 0 : index
    %113 = vector.load %arg11[%c0_55, %c0_56] : memref<16x32xf32, #tpu.memory_space<vmem>>, vector<16x32xf32>
    tpu.vector_store %arg11[%c0_55, %c0_56], %112 {strides = array<i32>} : memref<16x32xf32, #tpu.memory_space<vmem>>, vector<16x32xf32>,
    return
  }
}

</mosaic_0001>

<bundles_post_ra>
// kernel: tpu_custom_call.1
= control target key start
LH: loop header
LB: loop body
LE: loop exit
PB: predicated region body
PF: predicated region fallthrough
CT: control target
= control target key end

     0   :  { %16 = vsyncpa [#allocation3], 0  ;;  %s1957_s0 = inlined_call_operand.vmem [shape: f32[8,8,8], index: 0, kind: input, shape index: {}]   ;;  %s1958_s1 = inlined_call_operand.vmem [shape: f32[8,8,8], index: 1, kind: input, shape index: {}]   ;;  %s1959_s2 = inlined_call_operand.hbm [shape: f32[8,8,8], index: 2, kind: input, shape index: {}]   ;;  %s1960_s3 = inlined_call_operand.hbm [shape: f32[16,32], index: 3, kind: input, shape index: {}]   ;;  %s1961_s4 = inlined_call_operand.hbm [shape: f32[8,8], index: 4, kind: input, shape index: {}]   ;;  %s1962_s5 = inlined_call_operand.hbm [shape: f32[8,8], index: 5, kind: input, shape index: {}]   ;;  %s1963_s6 = inlined_call_operand.hbm [shape: f32[8,8], index: 6, kind: input, shape index: {}]   ;;  %s1964_s7 = inlined_call_operand.vmem [shape: f32[32,32], index: 7, kind: input, shape index: {}]   ;;  %s1965_s8 = inlined_call_operand.hbm [shape: f32[32,128], index: 8, kind: input, shape index: {}]   ;;  %s1966_s9 = inlined_call_operand.vmem [shape: f32[128,32], index: 9, kind: input, shape index: {}]   ;;  %s1967_s10 = inlined_call_operand.vmem [shape: f32[8,128], index: 10, kind: input, shape index: {}]   ;;  %s1968_s11 = inlined_call_operand.hbm [shape: f32[16,32], index: 11, kind: output, shape index: {}]  }
   0x1   :  { %17 = vsyncpa [#allocation6], 0 }
   0x2   :  { %18 = vsyncpa [#allocation9], 0 }
   0x3   :  { %19 = vsyncpa [#allocation12], 0 }
   0x4   :  { %20 = vsyncpa [#allocation4], 0  ;;  %s42_s19 = sshll.u32 %s1960_s3, 4  ;;  %s1586_s20 = smov [#allocation5]   ;;  %s43_s19 = int_to_ptr.hbm [resolvable:$true] %s42_s19 }
   0x5   :  { %s44_s21 = sshll.u32 %s1586_s20, 4  ;;  %s67_s24 = sshll.u32 %s1962_s5, 4  ;;  %s45_s21 = int_to_ptr.vmem [resolvable:$true] %s44_s21  ;;  %s68_s24 = int_to_ptr.hbm [resolvable:$true] %s67_s24 }
   0x6   :  { %s1587_s25 = smov 128   ;;  %s1588_s26 = smov 8  }
   0x7   :  { %50 = dma.hbm_to_vmem [thread:$0]  %s43_s19, 256, %s45_s21, [#allocation6], %s1587_s25, %s1587_s25, %s1588_s26  }
   0x8   :  { %s1589_s27 = smov [#allocation8]   ;;  %s29_s3 = sshll.u32 %s1959_s2, 4  ;;  %s30_s3 = int_to_ptr.hbm [resolvable:$true] %s29_s3 }
   0x9   :  { %s69_s28 = sshll.u32 %s1589_s27, 4  ;;  %s56_s5 = sshll.u32 %s1961_s4, 4  ;;  %s70_s28 = int_to_ptr.vmem [resolvable:$true] %s69_s28  ;;  %s57_s5 = int_to_ptr.hbm [resolvable:$true] %s56_s5 }
   0xa   :  { %72 = dma.hbm_to_vmem [thread:$0]  %s68_s24, 128, %s70_s28, [#allocation9]  }
   0xb   :  { %s1590_s14 = smov [#allocation2]   ;;  %s1591_s16 = smov [#allocation7]  }
   0xc   :  { %s31_s15 = sshll.u32 %s1590_s14, 4  ;;  %s58_s17 = sshll.u32 %s1591_s16, 4  ;;  %s32_s15 = int_to_ptr.vmem [resolvable:$true] %s31_s15  ;;  %s59_s17 = int_to_ptr.vmem [resolvable:$true] %s58_s17 }
   0xd   :  { %37 = dma.hbm_to_vmem [thread:$0]  %s30_s3, 1024, %s32_s15, [#allocation3], %s1587_s25, %s1587_s25, %s1588_s26  }
   0xe   :  { %s78_s2 = sshll.u32 %s1963_s6, 4  ;;  %s90_s4 = sshll.u32 %s1965_s8, 4  ;;  %s79_s2 = int_to_ptr.hbm [resolvable:$true] %s78_s2  ;;  %s91_s4 = int_to_ptr.hbm [resolvable:$true] %s90_s4 }
   0xf   :  { %61 = dma.hbm_to_vmem [thread:$0]  %s57_s5, 128, %s59_s17, [#allocation6]  }
  0x10   :  { %s1592_s22 = smov [#allocation10]   ;;  %s1593_s24 = smov [#allocation11]  }
  0x11   :  { %s80_s23 = sshll.u32 %s1592_s22, 4  ;;  %s92_s27 = sshll.u32 %s1593_s24, 4  ;;  %s81_s23 = int_to_ptr.vmem [resolvable:$true] %s80_s23  ;;  %s93_s27 = int_to_ptr.vmem [resolvable:$true] %s92_s27 }
  0x12   :  { %83 = dma.hbm_to_vmem [thread:$0]  %s79_s2, 128, %s81_s23, [#allocation9]  }
  0x13   :  { %98 = dma.hbm_to_vmem [thread:$0]  %s91_s4, 512, %s93_s27, [#allocation12], %s1587_s25, %s1587_s25, %s1588_s26  }
  0x14   :  { %1576 = dma.done.wait [#allocation3], 1024  }
  0x15   :  { %1577 = vsyncadd [#allocation3], 4294966272 }
  0x16   :  { %1578 = dma.done.wait [#allocation6], 384  }
  0x17   :  { %1579 = vsyncadd [#allocation6], 4294966912 }
  0x18   :  { %1580 = dma.done.wait [#allocation9], 256  }
  0x19   :  { %1581 = vsyncadd [#allocation9], 4294967040 }
  0x1a   :  { %1582 = dma.done.wait [#allocation12], 512  }
  0x1b   :  { %1583 = vsyncadd [#allocation12], 4294966784  ;;  %vm159_vm0 = vcmask 64512   ;;  %v233_v0 = vld [vmem:[#allocation8] sm:$0xff]  ;;  %v158_v1 = vld [vmem:[#allocation10] sm:$0xff]  ;;  %s1595_s5 = smov [#allocation13]  }
  0x1c   :  { %v142_v2 = vld [vmem:[%s1958_s1] sm:$0xff]  ;;  %273 = vmatpush.msra.mxu1 %v233_v0  ;;  %199 = vmatpush.msra.mxu0 %v158_v1  ;;  %v143_v4 = vld [vmem:[%s1958_s1 + $0x8] sm:$0xff]  ;;  %v148_v6 = vld [vmem:[%s1958_s1 + $0x30] sm:$0xff]  ;;  %s1272_s14 = sshll.u32 %s1595_s5, 4  ;;  %s1274_s17 = sshll.u32 %s1968_s11, 4  ;;  %s1273_s14 = int_to_ptr.vmem [resolvable:$true] %s1272_s14  ;;  %s1275_s17 = int_to_ptr.hbm [resolvable:$true] %s1274_s17 }
  0x1d   :  { %v134_v3 = vld [vmem:[#allocation2] sm:$0xff]  ;;  %1298 = vmatmul.msk.f32.vlgmr.msra.gmra.mxu1 %vm159_vm0, %v142_v2  ;;  %1348 = vmatpush.msra.mxu2 %v233_v0  ;;  %v135_v5 = vld [vmem:[#allocation2 + $0x8] sm:$0xff]  ;;  %v144_v7 = vld [vmem:[%s1958_s1 + $0x10] sm:$0xff] }
  0x1e   :  { %1290 = vmatmul.msk.f32.vlgmr.msra.gmra.mxu0 %vm159_vm0, %v134_v3  ;;  %1304 = vmatmul.msk.f32.vlgmr.msra.gmra.mxu2 %vm159_vm0, %v148_v6  ;;  %v136_v8 = vld [vmem:[#allocation2 + $0x10] sm:$0xff]  ;;  %v149_v9 = vld [vmem:[%s1958_s1 + $0x38] sm:$0xff]  ;;  %v146_v12 = vld [vmem:[%s1958_s1 + $0x20] sm:$0xff] }
  0x1f   :  { %v145_v10 = vld [vmem:[%s1958_s1 + $0x18] sm:$0xff]  ;;  %v138_v13 = vld [vmem:[#allocation2 + $0x20] sm:$0xff]  ;;  %v147_v14 = vld [vmem:[%s1958_s1 + $0x28] sm:$0xff] }
  0x20   :  { %v137_v11 = vld [vmem:[#allocation2 + $0x18] sm:$0xff]  ;;  %v139_v15 = vld [vmem:[#allocation2 + $0x28] sm:$0xff]  ;;  %v140_v16 = vld [vmem:[#allocation2 + $0x30] sm:$0xff] }
  0x21   :  { %v141_v17 = vld [vmem:[#allocation2 + $0x38] sm:$0xff]  ;;  %v299_v50 = vld [vmem:[#allocation7] sm:$0xff]  ;;  %v150_v51 = vld [vmem:[%s1957_s0] sm:$0xff] }
  0x22   :  { %339 = vmatpush.msrb.mxu2 %v299_v50  ;;  %v151_v54 = vld [vmem:[%s1957_s0 + $0x8] sm:$0xff]  ;;  %v152_v56 = vld [vmem:[%s1957_s0 + $0x10] sm:$0xff]  ;;  %v153_v62 = vld [vmem:[%s1957_s0 + $0x18] sm:$0xff] }
  0x23   :  { %v154_v63 = vld [vmem:[%s1957_s0 + $0x20] sm:$0xff] }
  0x25   :  { %1299 = vmatmul.msk.f32.gmra.mxu1 %vm159_vm0, %v143_v4 }
  0x26   :  { %1291 = vmatmul.msk.f32.gmra.mxu0 %vm159_vm0, %v135_v5  ;;  %1305 = vmatmul.msk.f32.gmra.mxu2 %vm159_vm0, %v149_v9 }
  0x2d   :  { %1300 = vmatmul.msk.f32.gmra.mxu1 %vm159_vm0, %v144_v7 }
  0x2e   :  { %1292 = vmatmul.msk.f32.gmra.mxu0 %vm159_vm0, %v136_v8  ;;  %1306 = vmatmul.msk.f32.vlgmr.msrb.gmra.mxu2 %vm159_vm0, %v150_v51 }
  0x35   :  { %1301 = vmatmul.msk.f32.gmra.mxu1 %vm159_vm0, %v145_v10  ;;  %v155_v10 = vld [vmem:[%s1957_s0 + $0x28] sm:$0xff] }
  0x36   :  { %1293 = vmatmul.msk.f32.gmra.mxu0 %vm159_vm0, %v137_v11  ;;  %1307 = vmatmul.msk.f32.gmra.mxu2 %vm159_vm0, %v151_v54 }
  0x3d   :  { %1302 = vmatmul.msk.f32.gmra.mxu1 %vm159_vm0, %v146_v12 }
  0x3e   :  { %1294 = vmatmul.msk.f32.gmra.mxu0 %vm159_vm0, %v138_v13  ;;  %1308 = vmatmul.msk.f32.gmra.mxu2 %vm159_vm0, %v152_v56 }
  0x45   :  { %1303 = vmatmul.msk.f32.gmra.mxu1 %vm159_vm0, %v147_v14 }
  0x46   :  { %1295 = vmatmul.msk.f32.gmra.mxu0 %vm159_vm0, %v139_v15  ;;  %1309 = vmatmul.msk.f32.gmra.mxu2 %vm159_vm0, %v153_v62 }
  0x4e   :  { %1296 = vmatmul.msk.f32.gmra.mxu0 %vm159_vm0, %v140_v16  ;;  %1310 = vmatmul.msk.f32.gmra.mxu2 %vm159_vm0, %v154_v63 }
  0x56   :  { %1297 = vmatmul.msk.f32.gmra.mxu0 %vm159_vm0, %v141_v17  ;;  %1311 = vmatmul.msk.f32.gmra.mxu2 %vm159_vm0, %v155_v10  ;;  %v156_v17 = vld [vmem:[%s1957_s0 + $0x30] sm:$0xff] }
  0x5e   :  { %1312 = vmatmul.msk.f32.gmra.mxu2 %vm159_vm0, %v156_v17 }
  0x9a   :  { %v275_v18 = vpop.f32.mrf.mxu1 }
  0x9b   :  { %v201_v19 = vpop.f32.mrf.mxu0  ;;  %1314 = vmatpush.xpose.msk.msra.mxu3 %vm159_vm0, %v275_v18 }
  0x9c   :  { %v225_v20 = vmul.f32 0.17677669, %v201_v19 }
  0x9e   :  { %1315 = vmatmul.msk.f32.vlgmr.msra.gmra.mxu3 %vm159_vm0, %v225_v20 }
  0xa1   :  { %v293_v30 = vpop.f32.mrf.mxu2 }
  0xa2   :  { %v278_v21 = vpop.f32.mrf.mxu1 }
  0xa3   :  { %v204_v22 = vpop.f32.mrf.mxu0  ;;  %1316 = vmatpush.xpose.msk.msrb.mxu3 %vm159_vm0, %v278_v21 }
  0xa4   :  { %v226_v23 = vmul.f32 0.17677669, %v204_v22 }
  0xa6   :  { %1317 = vmatmul.msk.f32.vlgmr.msrb.gmra.mxu3 %vm159_vm0, %v226_v23 }
  0xa9   :  { %v296_v37 = vpop.f32.mrf.mxu2 }
  0xaa   :  { %v281_v24 = vpop.f32.mrf.mxu1 }
  0xab   :  { %v207_v25 = vpop.f32.mrf.mxu0  ;;  %1318 = vmatpush.xpose.msk.msra.mxu3 %vm159_vm0, %v281_v24 }
  0xac   :  { %v227_v26 = vmul.f32 0.17677669, %v207_v25  ;;  %v157_v25 = vld [vmem:[%s1957_s0 + $0x38] sm:$0xff] }
  0xad   :  { %1313 = vmatmul.msk.f32.gmra.mxu2 %vm159_vm0, %v157_v25 }
  0xae   :  { %1319 = vmatmul.msk.f32.vlgmr.msra.gmra.mxu3 %vm159_vm0, %v227_v26 }
  0xb1   :  { %v341_v26 = vpop.f32.mrf.mxu2 }
  0xb2   :  { %v284_v27 = vpop.f32.mrf.mxu1 }
  0xb3   :  { %v210_v28 = vpop.f32.mrf.mxu0  ;;  %1320 = vmatpush.xpose.msk.msrb.mxu3 %vm159_vm0, %v284_v27 }
  0xb4   :  { %v228_v29 = vmul.f32 0.17677669, %v210_v28 }
  0xb6   :  { %1321 = vmatmul.msk.f32.vlgmr.msrb.gmra.mxu3 %vm159_vm0, %v228_v29 }
  0xba   :  { %v287_v31 = vpop.f32.mrf.mxu1 }
  0xbb   :  { %v213_v32 = vpop.f32.mrf.mxu0  ;;  %1322 = vmatpush.xpose.msk.msra.mxu3 %vm159_vm0, %v287_v31  ;;  %v344_v31 = vpop.f32.mrf.mxu2 }
  0xbc   :  { %v229_v33 = vmul.f32 0.17677669, %v213_v32  ;;  %806 = vmatpush.msrb.mxu1 %v344_v31 }
  0xbe   :  { %1323 = vmatmul.msk.f32.vlgmr.msra.gmra.mxu3 %vm159_vm0, %v229_v33 }
  0xc2   :  { %v290_v34 = vpop.f32.mrf.mxu1 }
  0xc3   :  { %v216_v35 = vpop.f32.mrf.mxu0  ;;  %1324 = vmatpush.xpose.msk.msrb.mxu3 %vm159_vm0, %v290_v34 }
  0xc4   :  { %v230_v36 = vmul.f32 0.17677669, %v216_v35 }
  0xc6   :  { %1325 = vmatmul.msk.f32.vlgmr.msrb.gmra.mxu3 %vm159_vm0, %v230_v36 }
  0xc7   :  { %1326 = vmatpush.xpose.msk.msra.mxu3 %vm159_vm0, %v293_v30 }
  0xcb   :  { %1328 = vmatpush.xpose.msk.msrb.mxu3 %vm159_vm0, %v296_v37  ;;  %v219_v38 = vpop.f32.mrf.mxu0  ;;  %v347_v37 = vpop.f32.mrf.mxu2 }
  0xcc   :  { %v231_v39 = vmul.f32 0.17677669, %v219_v38  ;;  %829 = vmatpush.msra.mxu2 %v347_v37 }
  0xce   :  { %1327 = vmatmul.msk.f32.vlgmr.msra.gmra.mxu3 %vm159_vm0, %v231_v39 }
  0xcf   :  { %783 = vmatpush.msra.mxu3 %v341_v26 }
  0xd3   :  { %v222_v40 = vpop.f32.mrf.mxu0 }
  0xd4   :  { %v232_v41 = vmul.f32 0.17677669, %v222_v40 }
  0xd6   :  { %1329 = vmatmul.msk.f32.vlgmr.msrb.gmra.mxu3 %vm159_vm0, %v232_v41 }
 0x121   :  { %v388_v42 = vpop.f32.mrf.mxu3 }
 0x122   :  { %v573_v43 = vsel %vm159_vm0, %v388_v42, -inf }
 0x123   :  { %574 = vmax.xlane.f32.xlu0 %v573_v43 }
 0x129   :  { %v414_v44 = vpop.f32.mrf.mxu3 }
 0x12a   :  { %v576_v45 = vsel %vm159_vm0, %v414_v44, -inf }
 0x12b   :  { %577 = vmax.xlane.f32.xlu2 %v576_v45 }
 0x131   :  { %v440_v46 = vpop.f32.mrf.mxu3 }
 0x132   :  { %v579_v47 = vsel %vm159_vm0, %v440_v46, -inf }
 0x133   :  { %580 = vmax.xlane.f32.xlu0 %v579_v47 }
 0x139   :  { %v466_v48 = vpop.f32.mrf.mxu3 }
 0x13a   :  { %v582_v49 = vsel %vm159_vm0, %v466_v48, -inf }
 0x13b   :  { %583 = vmax.xlane.f32.xlu1 %v582_v49 }
 0x141   :  { %v492_v52 = vpop.f32.mrf.mxu3 }
 0x142   :  { %v585_v53 = vsel %vm159_vm0, %v492_v52, -inf }
 0x143   :  { %586 = vmax.xlane.f32.xlu2 %v585_v53 }
 0x149   :  { %v1752_v55 = vpop.f32.mrf.mxu3 }
 0x14a   :  { %v588_v60 = vsel %vm159_vm0, %v1752_v55, -inf }
 0x151   :  { %v544_v57 = vpop.f32.mrf.mxu3 }
 0x152   :  { %v591_v58 = vsel %vm159_vm0, %v544_v57, -inf }
 0x153   :  { %592 = vmax.xlane.f32.xlu1 %v591_v58 }
 0x159   :  { %v1759_v59 = vpop.f32.mrf.mxu3 }
 0x15a   :  { %v594_v61 = vsel %vm159_vm0, %v1759_v59, -inf }
 0x15b   :  { %589 = vmax.xlane.f32.xlu1 %v588_v60  ;;  %595 = vmax.xlane.f32.xlu0 %v594_v61 }
 0x196   :  { %v575_v0 = vpop.xlane.xlu0 %574 }
 0x197   :  { %v597_v1 = vsub.f32 %v388_v42, %v575_v0 }
 0x199   :  { %v605_v2 = vmul.f32 1.442695, %v597_v1 }
 0x19b   :  { %1366 = vpow2.f32 %v605_v2 }
 0x19e   :  { %v578_v5 = vpop.xlane.xlu2 %577 }
 0x19f   :  { %v598_v8 = vsub.f32 %v414_v44, %v578_v5 }
 0x1a1   :  { %v1773_v3 = vpop.eup %1366  ;;  %v607_v11 = vmul.f32 1.442695, %v598_v8 }
 0x1a2   :  { %v621_v4 = vsel %vm159_vm0, %v1773_v3, 0.0 }
 0x1a3   :  { %622 = vadd.xlane.f32.xlu2 %v621_v4 }
 0x1a6   :  { %v581_v6 = vpop.xlane.xlu0 %580 }
 0x1a7   :  { %v599_v7 = vsub.f32 %v440_v46, %v581_v6  ;;  %v350_v46 = vpop.f32.mrf.mxu2 }
 0x1a8   :  { %852 = vmatpush.msrb.mxu3 %v350_v46 }
 0x1a9   :  { %v609_v9 = vmul.f32 1.442695, %v599_v7 }
 0x1ab   :  { %1368 = vpow2.f32 %v609_v9 }
 0x1ac   :  { %1370 = vpow2.f32 %v607_v11 }
 0x1ae   :  { %v584_v12 = vpop.xlane.xlu1 %583 }
 0x1af   :  { %v600_v13 = vsub.f32 %v466_v48, %v584_v12  ;;  %v353_v47 = vpop.f32.mrf.mxu2 }
 0x1b0   :  { %875 = vmatpush.msrb.mxu0 %v353_v47 }
 0x1b1   :  { %v1781_v14 = vpop.eup %1368  ;;  %v611_v15 = vmul.f32 1.442695, %v600_v13 }
 0x1b2   :  { %v627_v16 = vsel %vm159_vm0, %v1781_v14, 0.0  ;;  %v1789_v19 = vpop.eup %1370 }
 0x1b3   :  { %1372 = vpow2.f32 %v611_v15  ;;  %628 = vadd.xlane.f32.xlu0 %v627_v16  ;;  %v624_v24 = vsel %vm159_vm0, %v1789_v19, 0.0 }
 0x1b6   :  { %v587_v18 = vpop.xlane.xlu2 %586 }
 0x1b7   :  { %v601_v20 = vsub.f32 %v492_v52, %v587_v18  ;;  %v356_v6 = vpop.f32.mrf.mxu2 }
 0x1b8   :  { %898 = vmatpush.msra.mxu1 %v356_v6 }
 0x1b9   :  { %v1791_v21 = vpop.eup %1372  ;;  %v613_v22 = vmul.f32 1.442695, %v601_v20 }
 0x1ba   :  { %v630_v23 = vsel %vm159_vm0, %v1791_v21, 0.0 }
 0x1bb   :  { %1374 = vpow2.f32 %v613_v22  ;;  %631 = vadd.xlane.f32.xlu1 %v630_v23  ;;  %625 = vadd.xlane.f32.xlu0 %v624_v24 }
 0x1bf   :  { %v359_v25 = vpop.f32.mrf.mxu2 }
 0x1c0   :  { %921 = vmatpush.msrb.mxu2 %v359_v25  ;;  %v950_v25 = vld [vmem:[%s1964_s7 + $0x8] sm:$0xff] }
 0x1c1   :  { %v1801_v27 = vpop.eup %1374  ;;  %974 = vmatpush.msra.mxu0 %v950_v25 }
 0x1c2   :  { %v633_v28 = vsel %vm159_vm0, %v1801_v27, 0.0 }
 0x1c3   :  { %634 = vadd.xlane.f32.xlu1 %v633_v28 }
 0x1c6   :  { %v593_v29 = vpop.xlane.xlu1 %592 }
 0x1c7   :  { %v603_v30 = vsub.f32 %v544_v57, %v593_v29  ;;  %v362_v46 = vpop.f32.mrf.mxu2 }
 0x1c9   :  { %v617_v32 = vmul.f32 1.442695, %v603_v30 }
 0x1cb   :  { %1376 = vpow2.f32 %v617_v32 }
 0x1ce   :  { %v590_v33 = vpop.xlane.xlu1 %589  ;;  %v596_v34 = vpop.xlane.xlu0 %595 }
 0x1cf   :  { %v602_v35 = vsub.f32 %v1752_v55, %v590_v33  ;;  %v604_v36 = vsub.f32 %v1759_v59, %v596_v34 }
 0x1d1   :  { %v1807_v38 = vpop.eup %1376  ;;  %v615_v39 = vmul.f32 1.442695, %v602_v35  ;;  %v619_v40 = vmul.f32 1.442695, %v604_v36 }
 0x1d2   :  { %v639_v41 = vsel %vm159_vm0, %v1807_v38, 0.0 }
 0x1d3   :  { %1378 = vpow2.f32 %v615_v39  ;;  %640 = vadd.xlane.f32.xlu2 %v639_v41 }
 0x1d4   :  { %1380 = vpow2.f32 %v619_v40 }
 0x1d9   :  { %v1811_v42 = vpop.eup %1378 }
 0x1da   :  { %v1813_v43 = vpop.eup %1380  ;;  %v636_v44 = vsel %vm159_vm0, %v1811_v42, 0.0 }
 0x1db   :  { %637 = vadd.xlane.f32.xlu0 %v636_v44  ;;  %v642_v45 = vsel %vm159_vm0, %v1813_v43, 0.0 }
 0x1dc   :  { %643 = vadd.xlane.f32.xlu2 %v642_v45 }
 0x216   :  { %v623_v48 = vpop.xlane.xlu2 %622 }
 0x217   :  { %1382 = vrcp.f32 %v623_v48  ;;  %v656_v52 = vand.u32 2147483648, %v623_v48  ;;  %v654_v54 = vand.u32 2147483647, %v623_v48  ;;  %vm650_vm2 = vweird.f32 %v623_v48 }
 0x219   :  { %v657_v56 = vor.u32 1.1754944e-38, %v656_v52  ;;  %vm655_vm4 = vcmp.eq.f32.partialorder %v654_v54, 8.507059e+37 }
 0x21d   :  { %v1383_v49 = vpop.eup %1382 }
 0x21e   :  { %v646_v50 = vmul.f32 %v1383_v49, %v623_v48  ;;  %vm651_vm1 = vweird.f32 %v1383_v49 }
 0x21f   :  { %vm652_vm3 = vmor %vm650_vm2, %vm651_vm1 }
 0x220   :  { %v647_v51 = vsub.f32 1.0, %v646_v50 }
 0x222   :  { %v648_v53 = vmul.f32 %v1383_v49, %v647_v51 }
 0x224   :  { %v649_v55 = vadd.f32 %v1383_v49, %v648_v53 }
 0x226   :  { %v653_v57 = vsel %vm652_vm3, %v1383_v49, %v649_v55  ;;  %v629_v58 = vpop.xlane.xlu0 %628 }
 0x227   :  { %v658_v59 = vsel %vm655_vm4, %v657_v56, %v653_v57  ;;  %1384 = vrcp.f32 %v629_v58  ;;  %v684_v2 = vand.u32 2147483648, %v629_v58  ;;  %v682_v5 = vand.u32 2147483647, %v629_v58 }
 0x228   :  { %v757_v60 = vmul.f32 %v1773_v3, %v658_v59  ;;  %vm678_vm6 = vweird.f32 %v629_v58 }
 0x229   :  { %v685_v3 = vor.u32 1.1754944e-38, %v684_v2  ;;  %vm683_vm8 = vcmp.eq.f32.partialorder %v682_v5, 8.507059e+37 }
 0x22a   :  { %1330 = vmatmul.msk.f32.vlgmr.msra.gmra.mxu3 %vm159_vm0, %v757_v60 }
 0x22b   :  { %944 = vmatpush.msra.mxu3 %v362_v46 }
 0x22d   :  { %v1385_v61 = vpop.eup %1384 }
 0x22e   :  { %v674_v62 = vmul.f32 %v1385_v61, %v629_v58  ;;  %v632_v63 = vpop.xlane.xlu1 %631  ;;  %v626_v0 = vpop.xlane.xlu0 %625  ;;  %vm679_vm5 = vweird.f32 %v1385_v61 }
 0x22f   :  { %1386 = vrcp.f32 %v632_v63  ;;  %vm680_vm7 = vmor %vm678_vm6, %vm679_vm5  ;;  %v698_v17 = vand.u32 2147483648, %v632_v63  ;;  %v696_v23 = vand.u32 2147483647, %v632_v63  ;;  %v670_v24 = vand.u32 2147483648, %v626_v0 }
 0x230   :  { %v675_v1 = vsub.f32 1.0, %v674_v62  ;;  %1388 = vrcp.f32 %v626_v0  ;;  %v668_v28 = vand.u32 2147483647, %v626_v0  ;;  %vm692_vm11 = vweird.f32 %v632_v63 }
 0x231   :  { %v699_v31 = vor.u32 1.1754944e-38, %v698_v17  ;;  %vm664_vm13 = vweird.f32 %v626_v0  ;;  %vm697_vm14 = vcmp.eq.f32.partialorder %v696_v23, 8.507059e+37 }
 0x232   :  { %v676_v4 = vmul.f32 %v1385_v61, %v675_v1  ;;  %vm669_vm1 = vcmp.eq.f32.partialorder %v668_v28, 8.507059e+37 }
 0x234   :  { %v677_v7 = vadd.f32 %v1385_v61, %v676_v4 }
 0x235   :  { %v1387_v8 = vpop.eup %1386 }
 0x236   :  { %v1389_v9 = vpop.eup %1388  ;;  %v681_v10 = vsel %vm680_vm7, %v1385_v61, %v677_v7  ;;  %v688_v11 = vmul.f32 %v1387_v8, %v632_v63  ;;  %v635_v12 = vpop.xlane.xlu1 %634  ;;  %vm693_vm9 = vweird.f32 %v1387_v8 }
 0x237   :  { %v686_v13 = vsel %vm683_vm8, %v685_v3, %v681_v10  ;;  %v660_v15 = vmul.f32 %v1389_v9, %v626_v0  ;;  %1390 = vrcp.f32 %v635_v12  ;;  %vm665_vm10 = vweird.f32 %v1389_v9  ;;  %vm694_vm12 = vmor %vm692_vm11, %vm693_vm9 }
 0x238   :  { %v689_v16 = vsub.f32 1.0, %v688_v11  ;;  %v759_v20 = vmul.f32 %v1781_v14, %v686_v13  ;;  %vm666_vm15 = vmor %vm664_vm13, %vm665_vm10  ;;  %v671_v14 = vor.u32 1.1754944e-38, %v670_v24  ;;  %v712_v45 = vand.u32 2147483648, %v635_v12  ;;  %v949_v24 = vld [vmem:[%s1964_s7] sm:$0xff] }
 0x239   :  { %v661_v18 = vsub.f32 1.0, %v660_v15  ;;  %v710_v47 = vand.u32 2147483647, %v635_v12  ;;  %vm706_vm3 = vweird.f32 %v635_v12 }
 0x23a   :  { %v690_v22 = vmul.f32 %v1387_v8, %v689_v16  ;;  %1332 = vmatmul.msk.f32.vlgmr.msra.gmra.mxu2 %vm159_vm0, %v759_v20  ;;  %v713_v49 = vor.u32 1.1754944e-38, %v712_v45  ;;  %v1076_v45 = vld [vmem:[#allocation5] sm:$0xff] }
 0x23b   :  { %v662_v26 = vmul.f32 %v1389_v9, %v661_v18  ;;  %vm711_vm5 = vcmp.eq.f32.partialorder %v710_v47, 8.507059e+37 }
 0x23c   :  { %v691_v29 = vadd.f32 %v1387_v8, %v690_v22 }
 0x23d   :  { %v1391_v30 = vpop.eup %1390  ;;  %v663_v32 = vadd.f32 %v1389_v9, %v662_v26 }
 0x23e   :  { %v695_v33 = vsel %vm694_vm12, %v1387_v8, %v691_v29  ;;  %v702_v34 = vmul.f32 %v1391_v30, %v635_v12  ;;  %vm707_vm2 = vweird.f32 %v1391_v30 }
 0x23f   :  { %v700_v35 = vsel %vm697_vm14, %v699_v31, %v695_v33  ;;  %v667_v36 = vsel %vm666_vm15, %v1389_v9, %v663_v32  ;;  %vm708_vm4 = vmor %vm706_vm3, %vm707_vm2  ;;  %vm1080_vm3 = vcmask 261120  }
 0x240   :  { %v703_v37 = vsub.f32 1.0, %v702_v34  ;;  %v672_v39 = vsel %vm669_vm1, %v671_v14, %v667_v36  ;;  %v760_v40 = vmul.f32 %v1791_v21, %v700_v35 }
 0x241   :  { %v758_v41 = vmul.f32 %v1789_v19, %v672_v39 }
 0x242   :  { %v704_v44 = vmul.f32 %v1391_v30, %v703_v37  ;;  %1333 = vmatmul.msk.f32.vlgmr.msrb.gmra.mxu3 %vm159_vm0, %v760_v40  ;;  %v1359_v40 = vld [vmem:[%s1967_s10] ss:$0 sm:$0xff] }
 0x243   :  { %1331 = vmatmul.msk.f32.vlgmr.msrb.gmra.mxu1 %vm159_vm0, %v758_v41 }
 0x244   :  { %v705_v48 = vadd.f32 %v1391_v30, %v704_v44  ;;  %1003 = vmatpush.msrb.mxu1 %v949_v24  ;;  %v1186_v24 = vld [vmem:[%s1966_s9 + $0x60] sm:$0xff] }
 0x246   :  { %v641_v50 = vpop.xlane.xlu2 %640  ;;  %v709_v51 = vsel %vm708_vm4, %v1391_v30, %v705_v48 }
 0x247   :  { %1392 = vrcp.f32 %v641_v50  ;;  %v714_v21 = vsel %vm711_vm5, %v713_v49, %v709_v51  ;;  %v740_v57 = vand.u32 2147483648, %v641_v50  ;;  %v738_v59 = vand.u32 2147483647, %v641_v50 }
 0x248   :  { %v761_v19 = vmul.f32 %v1801_v27, %v714_v21  ;;  %vm734_vm7 = vweird.f32 %v641_v50 }
 0x249   :  { %v741_v62 = vor.u32 1.1754944e-38, %v740_v57  ;;  %vm739_vm9 = vcmp.eq.f32.partialorder %v738_v59, 8.507059e+37 }
 0x24a   :  { %1334 = vmatmul.msk.f32.vlgmr.msrb.gmra.mxu0 %vm159_vm0, %v761_v19 }
 0x24d   :  { %v1393_v52 = vpop.eup %1392 }
 0x24e   :  { %v730_v53 = vmul.f32 %v1393_v52, %v641_v50  ;;  %v638_v54 = vpop.xlane.xlu0 %637  ;;  %vm735_vm6 = vweird.f32 %v1393_v52 }
 0x24f   :  { %v644_v55 = vpop.xlane.xlu2 %643  ;;  %1394 = vrcp.f32 %v638_v54  ;;  %vm736_vm8 = vmor %vm734_vm7, %vm735_vm6  ;;  %v726_v7 = vand.u32 2147483648, %v638_v54  ;;  %v724_v9 = vand.u32 2147483647, %v638_v54  ;;  %vm720_vm12 = vweird.f32 %v638_v54 }
 0x250   :  { %v731_v56 = vsub.f32 1.0, %v730_v53  ;;  %1396 = vrcp.f32 %v644_v55  ;;  %v754_v8 = vand.u32 2147483648, %v644_v55  ;;  %v752_v11 = vand.u32 2147483647, %v644_v55 }
 0x251   :  { %vm748_vm13 = vweird.f32 %v644_v55  ;;  %v727_v15 = vor.u32 1.1754944e-38, %v726_v7  ;;  %vm725_vm1 = vcmp.eq.f32.partialorder %v724_v9, 8.507059e+37 }
 0x252   :  { %v732_v58 = vmul.f32 %v1393_v52, %v731_v56  ;;  %v755_v16 = vor.u32 1.1754944e-38, %v754_v8  ;;  %vm753_vm2 = vcmp.eq.f32.partialorder %v752_v11, 8.507059e+37  ;;  %v1140_v11 = vld [vmem:[#allocation11 + $0x10] sm:$0xff] }
 0x254   :  { %v733_v60 = vadd.f32 %v1393_v52, %v732_v58  ;;  %v1594_v58 = vmov 32.0  }
 0x255   :  { %v1395_v61 = vpop.eup %1394  ;;  %1398 = vrcp.f32 %v1594_v58  ;;  %v1174_v58 = vld [vmem:[%s1966_s9] sm:$0xff] }
 0x256   :  { %v1397_v63 = vpop.eup %1396  ;;  %v737_v27 = vsel %vm736_vm8, %v1393_v52, %v733_v60  ;;  %v716_v0 = vmul.f32 %v1395_v61, %v638_v54  ;;  %vm721_vm10 = vweird.f32 %v1395_v61  ;;  %v1077_v54 = vld [vmem:[#allocation5 + $0x8] sm:$0xff] }
 0x257   :  { %v742_v1 = vsel %vm739_vm9, %v741_v62, %v737_v27  ;;  %v744_v2 = vmul.f32 %v1397_v63, %v644_v55  ;;  %vm749_vm11 = vweird.f32 %v1397_v63  ;;  %vm722_vm14 = vmor %vm720_vm12, %vm721_vm10 }
 0x258   :  { %v717_v4 = vsub.f32 1.0, %v716_v0  ;;  %v763_v5 = vmul.f32 %v1807_v38, %v742_v1  ;;  %vm750_vm15 = vmor %vm748_vm13, %vm749_vm11 }
 0x259   :  { %v745_v6 = vsub.f32 1.0, %v744_v2 }
 0x25a   :  { %v718_v3 = vmul.f32 %v1395_v61, %v717_v4  ;;  %1336 = vmatmul.msk.f32.vlgmr.msrb.gmra.mxu2 %vm159_vm0, %v763_v5 }
 0x25b   :  { %v746_v10 = vmul.f32 %v1397_v63, %v745_v6  ;;  %v1399_v59 = vpop.eup %1398 }
 0x25c   :  { %v719_v12 = vadd.f32 %v1395_v61, %v718_v3  ;;  %v1088_v60 = vmul.f32 32.0, %v1399_v59 }
 0x25d   :  { %v747_v13 = vadd.f32 %v1397_v63, %v746_v10  ;;  %v1141_v10 = vld [vmem:[#allocation11 + $0x18] sm:$0xff] }
 0x25e   :  { %v723_v38 = vsel %vm722_vm14, %v1395_v61, %v719_v12  ;;  %v1089_v61 = vsub.f32 1.0, %v1088_v60  ;;  %1161 = vmatpush.msrb.mxu0 %v1141_v10  ;;  %v1139_v12 = vld [vmem:[#allocation11 + $0x8] sm:$0xff] }
 0x25f   :  { %v751_v17 = vsel %vm750_vm15, %v1397_v63, %v747_v13  ;;  %v728_v18 = vsel %vm725_vm1, %v727_v15, %v723_v38  ;;  %v1138_v13 = vld [vmem:[#allocation11] sm:$0xff] }
 0x260   :  { %v756_v20 = vsel %vm753_vm2, %v755_v16, %v751_v17  ;;  %v762_v22 = vmul.f32 %v1811_v42, %v728_v18  ;;  %v951_v42 = vld [vmem:[%s1964_s7 + $0x10] sm:$0xff]  ;;  %v1090_v62 = vmul.f32 %v1399_v59, %v1089_v61  ;;  %1162 = vmatpush.msrb.mxu0 %v1140_v11  ;;  %v1189_v17 = vld [vmem:[%s1966_s9 + $0x78] sm:$0xff] }
 0x261   :  { %v764_v23 = vmul.f32 %v1813_v43, %v756_v20  ;;  %1032 = vmatpush.msra.mxu2 %v951_v42  ;;  %v952_v43 = vld [vmem:[%s1964_s7 + $0x18] sm:$0xff]  ;;  %v1188_v18 = vld [vmem:[%s1966_s9 + $0x70] sm:$0xff]  ;;  %v1187_v20 = vld [vmem:[%s1966_s9 + $0x68] sm:$0xff] }
 0x262   :  { %1335 = vmatmul.msk.f32.vlgmr.msra.gmra.mxu1 %vm159_vm0, %v762_v22  ;;  %1063 = vmatpush.msrb.mxu3 %v952_v43  ;;  %v1091_v63 = vadd.f32 %v1399_v59, %v1090_v62 }
 0x263   :  { %1337 = vmatmul.msk.f32.vlgmr.msra.gmra.mxu3 %vm159_vm0, %v764_v23  ;;  %1163 = vmatpush.msrb.mxu0 %v1139_v12 }
 0x264   :  { %1191 = vmatpush.msra.mxu1 %v1189_v17 }
 0x265   :  { %1164 = vmatpush.msrb.mxu0 %v1138_v13 }
 0x266   :  { %1192 = vmatpush.msra.mxu1 %v1188_v18 }
 0x268   :  { %1193 = vmatpush.msra.mxu1 %v1187_v20 }
 0x26a   :  { %1194 = vmatpush.msra.mxu1 %v1186_v24 }
 0x2ad   :  { %v785_v26 = vpop.f32.mrf.mxu3 }
 0x2ae   :  { %1340 = vmatmul.msk.f32.vlgmr.msrb.gmra.mxu1 %vm159_vm0, %v785_v26  ;;  %v1185_v26 = vld [vmem:[%s1966_s9 + $0x58] sm:$0xff] }
 0x2af   :  { %1195 = vmatpush.msra.mxu1 %v1185_v26 }
 0x2bd   :  { %v831_v28 = vpop.f32.mrf.mxu2 }
 0x2be   :  { %1338 = vmatmul.msk.f32.vlgmr.msra.gmra.mxu0 %vm159_vm0, %v831_v28 }
 0x2c0   :  { %v808_v29 = vpop.f32.mrf.mxu1 }
 0x2c1   :  { %1341 = vmatmul.msk.f32.gmra.mxu1 %vm159_vm0, %v808_v29  ;;  %v1184_v29 = vld [vmem:[%s1966_s9 + $0x50] sm:$0xff] }
 0x2c2   :  { %1196 = vmatpush.msra.mxu1 %v1184_v29 }
 0x2c5   :  { %v854_v30 = vpop.f32.mrf.mxu3 }
 0x2c6   :  { %1339 = vmatmul.msk.f32.gmra.mxu0 %vm159_vm0, %v854_v30 }
 0x2c7   :  { %v877_v31 = vpop.f32.mrf.mxu0 }
 0x2c8   :  { %1342 = vmatmul.msk.f32.vlgmr.msra.gmra.mxu2 %vm159_vm0, %v877_v31  ;;  %v1183_v31 = vld [vmem:[%s1966_s9 + $0x48] sm:$0xff] }
 0x2c9   :  { %1197 = vmatpush.msra.mxu1 %v1183_v31 }
 0x2dd   :  { %v923_v32 = vpop.f32.mrf.mxu2 }
 0x2de   :  { %1344 = vmatmul.msk.f32.vlgmr.msrb.gmra.mxu3 %vm159_vm0, %v923_v32 }
 0x2df   :  { %v900_v33 = vpop.f32.mrf.mxu1 }
 0x2e0   :  { %1343 = vmatmul.msk.f32.gmra.mxu2 %vm159_vm0, %v900_v33  ;;  %v1182_v33 = vld [vmem:[%s1966_s9 + $0x40] sm:$0xff] }
 0x2e1   :  { %1198 = vmatpush.msra.mxu1 %v1182_v33 }
 0x2e6   :  { %v946_v14 = vpop.f32.mrf.mxu3 }
 0x2e7   :  { %1345 = vmatmul.msk.f32.gmra.mxu3 %vm159_vm0, %v946_v14  ;;  %vm1092_vm0 = vweird.f32 %v1399_v59 }
 0x2e8   :  { %v1860_v27 = vsel %vm1092_vm0, %v1399_v59, %v1091_v63  ;;  %v1362_v59 = vld [vmem:[%s1967_s10 + $0x6] ss:$0 sm:$0xff] }
 0x32b   :  { %v1005_v35 = vpop.f32.mrf.mxu1 }
 0x33b   :  { %v976_v34 = vpop.f32.mrf.mxu0 }
 0x33c   :  { %v1006_v37 = vadd.f32 %v1005_v35, %v976_v34  ;;  %v1181_v35 = vld [vmem:[%s1966_s9 + $0x38] sm:$0xff] }
 0x33d   :  { %1199 = vmatpush.msra.mxu1 %v1181_v35 }
 0x33e   :  { %v1008_v48 = vpop.f32.mrf.mxu1 }
 0x343   :  { %v979_v46 = vpop.f32.mrf.mxu0 }
 0x344   :  { %v1009_v51 = vadd.f32 %v1008_v48, %v979_v46  ;;  %v1179_v46 = vld [vmem:[%s1966_s9 + $0x28] sm:$0xff] }
 0x34b   :  { %v1034_v36 = vpop.f32.mrf.mxu2 }
 0x34c   :  { %v1040_v39 = vadd.f32 %v1034_v36, %v1006_v37  ;;  %v1360_v36 = vld [vmem:[%s1967_s10 + $0x1] ss:$0 sm:$0xff] }
 0x361   :  { %v1065_v41 = vpop.f32.mrf.mxu3 }
 0x362   :  { %v1071_v44 = vadd.f32 %v1065_v41, %v1040_v39 }
 0x363   :  { %v1037_v49 = vpop.f32.mrf.mxu2 }
 0x364   :  { %v1074_v47 = vadd.f32 %v1359_v40, %v1071_v44  ;;  %v1041_v19 = vadd.f32 %v1037_v49, %v1009_v51  ;;  %v1178_v49 = vld [vmem:[%s1966_s9 + $0x20] sm:$0xff] }
 0x366   :  { %v1078_v50 = vadd.f32 %v1076_v45, %v1074_v47  ;;  %v1361_v45 = vld [vmem:[%s1967_s10 + $0x2] ss:$0 sm:$0xff] }
 0x368   :  { %v1081_v21 = vsel %vm1080_vm3, %v1078_v50, 0.0 }
 0x369   :  { %1082 = vadd.xlane.f32.xlu1 %v1081_v21  ;;  %v1177_v21 = vld [vmem:[%s1966_s9 + $0x18] sm:$0xff] }
 0x36a   :  { %v1068_v52 = vpop.f32.mrf.mxu3 }
 0x36b   :  { %v1072_v53 = vadd.f32 %v1068_v52, %v1041_v19 }
 0x36d   :  { %v1075_v55 = vadd.f32 %v1359_v40, %v1072_v53  ;;  %v1180_v40 = vld [vmem:[%s1966_s9 + $0x30] sm:$0xff] }
 0x36e   :  { %1200 = vmatpush.msra.mxu1 %v1180_v40 }
 0x36f   :  { %v1079_v56 = vadd.f32 %v1077_v54, %v1075_v55 }
 0x370   :  { %1201 = vmatpush.msra.mxu1 %v1179_v46 }
 0x371   :  { %v1084_v57 = vsel %vm1080_vm3, %v1079_v56, 0.0 }
 0x372   :  { %1085 = vadd.xlane.f32.xlu2 %v1084_v57  ;;  %1202 = vmatpush.msra.mxu1 %v1178_v49  ;;  %v1175_v57 = vld [vmem:[%s1966_s9 + $0x8] sm:$0xff] }
 0x374   :  { %1203 = vmatpush.msra.mxu1 %v1177_v21 }
 0x3dc   :  { %v1083_v0 = vpop.xlane.xlu1 %1082 }
 0x3dd   :  { %v1094_v1 = vmul.f32 %v1860_v27, %v1083_v0 }
 0x3df   :  { %v1096_v2 = vsub.f32 %v1078_v50, %v1094_v1 }
 0x3e1   :  { %v1098_v4 = vmul.f32 %v1096_v2, %v1096_v2 }
 0x3e3   :  { %v1100_v5 = vsel %vm1080_vm3, %v1098_v4, 0.0 }
 0x3e4   :  { %1101 = vadd.xlane.f32.xlu0 %v1100_v5 }
 0x3e5   :  { %v1086_v6 = vpop.xlane.xlu2 %1085 }
 0x3e6   :  { %v1095_v7 = vmul.f32 %v1860_v27, %v1086_v6 }
 0x3e8   :  { %v1865_v8 = vsub.f32 %v1079_v56, %v1095_v7  ;;  %v1176_v56 = vld [vmem:[%s1966_s9 + $0x10] sm:$0xff] }
 0x3e9   :  { %1204 = vmatpush.msra.mxu1 %v1176_v56 }
 0x3ea   :  { %v1099_v3 = vmul.f32 %v1865_v8, %v1865_v8 }
 0x3eb   :  { %1205 = vmatpush.msra.mxu1 %v1175_v57 }
 0x3ec   :  { %v1103_v9 = vsel %vm1080_vm3, %v1099_v3, 0.0 }
 0x3ed   :  { %1104 = vadd.xlane.f32.xlu1 %v1103_v9  ;;  %1206 = vmatpush.msra.mxu1 %v1174_v58 }
 0x457   :  { %v1102_v15 = vpop.xlane.xlu0 %1101 }
 0x458   :  { %v1106_v16 = vmul.f32 %v1102_v15, %v1860_v27 }
 0x45a   :  { %v1108_v38 = vadd.f32 1e-05, %v1106_v16 }
 0x45c   :  { %1400 = vrsqrt.f32 %v1108_v38  ;;  %vm1116_vm5 = vweird.f32 %v1108_v38 }
 0x460   :  { %v1105_v22 = vpop.xlane.xlu1 %1104 }
 0x461   :  { %v1107_v23 = vmul.f32 %v1105_v22, %v1860_v27 }
 0x462   :  { %v1401_v25 = vpop.eup %1400 }
 0x463   :  { %v1111_v42 = vmul.f32 %v1401_v25, %v1108_v38  ;;  %v1109_v43 = vadd.f32 1e-05, %v1107_v23  ;;  %vm1117_vm4 = vweird.f32 %v1401_v25 }
 0x464   :  { %vm1118_vm6 = vmor %vm1116_vm5, %vm1117_vm4 }
 0x465   :  { %v1112_v28 = vmul.f32 %v1401_v25, %v1111_v42  ;;  %1402 = vrsqrt.f32 %v1109_v43  ;;  %vm1126_vm8 = vweird.f32 %v1109_v43 }
 0x467   :  { %v1113_v30 = vmul.f32 0.5, %v1112_v28 }
 0x469   :  { %v1114_v32 = vsub.f32 1.5, %v1113_v30 }
 0x46b   :  { %v1403_v14 = vpop.eup %1402  ;;  %v1115_v34 = vmul.f32 %v1401_v25, %v1114_v32 }
 0x46c   :  { %v1121_v37 = vmul.f32 %v1403_v14, %v1109_v43  ;;  %vm1127_vm7 = vweird.f32 %v1403_v14 }
 0x46d   :  { %v1119_v39 = vsel %vm1118_vm6, %v1401_v25, %v1115_v34  ;;  %vm1128_vm9 = vmor %vm1126_vm8, %vm1127_vm7  ;;  %v1364_v34 = vld [vmem:[%s1967_s10 + $0x4] ss:$0 sm:$0xff] }
 0x46e   :  { %v1130_v41 = vmul.f32 %v1119_v39, %v1096_v2  ;;  %v1122_v44 = vmul.f32 %v1403_v14, %v1121_v37  ;;  %v1363_v2 = vld [vmem:[%s1967_s10 + $0x3] ss:$0 sm:$0xff]  ;;  %v1365_v39 = vld [vmem:[%s1967_s10 + $0x5] ss:$0 sm:$0xff] }
 0x470   :  { %v1133_v47 = vmul.f32 %v1360_v36, %v1130_v41  ;;  %v1123_v48 = vmul.f32 0.5, %v1122_v44 }
 0x472   :  { %v1124_v50 = vsub.f32 1.5, %v1123_v48  ;;  %v1136_v51 = vadd.f32 %v1361_v45, %v1133_v47 }
 0x474   :  { %v1125_v19 = vmul.f32 %v1403_v14, %v1124_v50  ;;  %1346 = vmatmul.msk.f32.vlgmr.msrb.gmra.mxu0 %vm1080_vm3, %v1136_v51 }
 0x476   :  { %v1129_v52 = vsel %vm1128_vm9, %v1403_v14, %v1125_v19 }
 0x477   :  { %v1131_v53 = vmul.f32 %v1129_v52, %v1865_v8 }
 0x479   :  { %v1134_v54 = vmul.f32 %v1360_v36, %v1131_v53 }
 0x47b   :  { %v1137_v55 = vadd.f32 %v1361_v45, %v1134_v54 }
 0x47d   :  { %1347 = vmatmul.msk.f32.gmra.mxu0 %vm1080_vm3, %v1137_v55 }
 0x4f1   :  { %v1166_v60 = vpop.f32.mrf.mxu0 }
 0x4f2   :  { %v1167_v61 = vadd.f32 %v1362_v59, %v1166_v60 }
 0x4f4   :  { %v1172_v62 = vmax.f32 %v1167_v61, 0.0 }
 0x4f6   :  { %1207 = vmatmul.f32.vlgmr.msra.gmra.mxu1 %v1172_v62 }
 0x4fa   :  { %v1169_v63 = vpop.f32.mrf.mxu0 }
 0x4fb   :  { %v1170_v0 = vadd.f32 %v1362_v59, %v1169_v63 }
 0x4fd   :  { %v1173_v1 = vmax.f32 %v1170_v0, 0.0 }
 0x4ff   :  { %1210 = vmatmul.f32.gmra.mxu1 %v1173_v1 }
 0x573   :  { %v1208_v4 = vpop.f32.mrf.mxu1 }
 0x574   :  { %v1209_v5 = vadd.f32 %v1363_v2, %v1208_v4 }
 0x576   :  { %v1214_v6 = vadd.f32 %v1209_v5, %v1136_v51 }
 0x578   :  { %v1216_v7 = vsel %vm1080_vm3, %v1214_v6, 0.0 }
 0x579   :  { %1217 = vadd.xlane.f32.xlu2 %v1216_v7 }
 0x57c   :  { %v1211_v8 = vpop.f32.mrf.mxu1 }
 0x57d   :  { %v1212_v3 = vadd.f32 %v1363_v2, %v1211_v8 }
 0x57f   :  { %v1215_v9 = vadd.f32 %v1212_v3, %v1137_v55 }
 0x581   :  { %v1219_v10 = vsel %vm1080_vm3, %v1215_v9, 0.0 }
 0x582   :  { %1220 = vadd.xlane.f32.xlu0 %v1219_v10 }
 0x5ec   :  { %v1218_v11 = vpop.xlane.xlu2 %1217 }
 0x5ed   :  { %v1222_v12 = vmul.f32 %v1218_v11, %v1860_v27 }
 0x5ef   :  { %v1224_v13 = vsub.f32 %v1214_v6, %v1222_v12 }
 0x5f1   :  { %v1226_v15 = vmul.f32 %v1224_v13, %v1224_v13 }
 0x5f3   :  { %v1228_v16 = vsel %vm1080_vm3, %v1226_v15, 0.0 }
 0x5f4   :  { %1229 = vadd.xlane.f32.xlu1 %v1228_v16 }
 0x5f5   :  { %v1221_v38 = vpop.xlane.xlu0 %1220 }
 0x5f6   :  { %v1223_v17 = vmul.f32 %v1221_v38, %v1860_v27 }
 0x5f8   :  { %v1225_v18 = vsub.f32 %v1215_v9, %v1223_v17 }
 0x5fa   :  { %v1227_v20 = vmul.f32 %v1225_v18, %v1225_v18 }
 0x5fc   :  { %v1231_v22 = vsel %vm1080_vm3, %v1227_v20, 0.0 }
 0x5fd   :  { %1232 = vadd.xlane.f32.xlu2 %v1231_v22 }
 0x667   :  { %v1230_v23 = vpop.xlane.xlu1 %1229 }
 0x668   :  { %v1234_v24 = vmul.f32 %v1230_v23, %v1860_v27 }
 0x66a   :  { %v1236_v25 = vadd.f32 1e-05, %v1234_v24 }
 0x66c   :  { %1404 = vrsqrt.f32 %v1236_v25  ;;  %vm1244_vm11 = vweird.f32 %v1236_v25 }
 0x670   :  { %v1233_v42 = vpop.xlane.xlu2 %1232 }
 0x671   :  { %v1235_v43 = vmul.f32 %v1233_v42, %v1860_v27 }
 0x672   :  { %v1405_v26 = vpop.eup %1404 }
 0x673   :  { %v1239_v28 = vmul.f32 %v1405_v26, %v1236_v25  ;;  %v1237_v29 = vadd.f32 1e-05, %v1235_v43  ;;  %vm1245_vm10 = vweird.f32 %v1405_v26 }
 0x674   :  { %vm1246_vm12 = vmor %vm1244_vm11, %vm1245_vm10 }
 0x675   :  { %v1240_v30 = vmul.f32 %v1405_v26, %v1239_v28  ;;  %1406 = vrsqrt.f32 %v1237_v29  ;;  %vm1254_vm14 = vweird.f32 %v1237_v29 }
 0x677   :  { %v1241_v31 = vmul.f32 0.5, %v1240_v30 }
 0x679   :  { %v1242_v32 = vsub.f32 1.5, %v1241_v31 }
 0x67b   :  { %v1407_v33 = vpop.eup %1406  ;;  %v1243_v14 = vmul.f32 %v1405_v26, %v1242_v32 }
 0x67c   :  { %v1249_v35 = vmul.f32 %v1407_v33, %v1237_v29  ;;  %vm1255_vm13 = vweird.f32 %v1407_v33 }
 0x67d   :  { %v1247_v36 = vsel %vm1246_vm12, %v1405_v26, %v1243_v14  ;;  %vm1256_vm15 = vmor %vm1254_vm14, %vm1255_vm13 }
 0x67e   :  { %v1258_v37 = vmul.f32 %v1247_v36, %v1224_v13  ;;  %v1250_v27 = vmul.f32 %v1407_v33, %v1249_v35 }
 0x680   :  { %v1261_v40 = vmul.f32 %v1364_v34, %v1258_v37  ;;  %v1251_v41 = vmul.f32 0.5, %v1250_v27 }
 0x682   :  { %v1252_v44 = vsub.f32 1.5, %v1251_v41  ;;  %v1264_v45 = vadd.f32 %v1365_v39, %v1261_v40 }
 0x684   :  { %v1253_v46 = vmul.f32 %v1407_v33, %v1252_v44  ;;  %1266 = vst.msk [vmem:[#allocation13] sm:$0xff] %vm1080_vm3, %v1264_v45 }
 0x686   :  { %v1257_v47 = vsel %vm1256_vm15, %v1407_v33, %v1253_v46 }
 0x687   :  { %v1259_v48 = vmul.f32 %v1257_v47, %v1225_v18 }
 0x689   :  { %v1262_v49 = vmul.f32 %v1364_v34, %v1259_v48 }
 0x68b   :  { %v1265_v50 = vadd.f32 %v1365_v39, %v1262_v49 }
 0x68d   :  { %1267 = vst.msk [vmem:[#allocation13 + $0x8] sm:$0xff] %vm1080_vm3, %v1265_v50 }
 0x68e   :  { %1280 = dma.vmem_to_hbm [thread:$0]  %s1273_s14, 256, %s1275_s17, [#allocation4], %s1587_s25, %s1587_s25, %s1588_s26  }
 0x68f   :  { %1584 = dma.done.wait [#allocation4], 256  }
 0x690   :  { %1585 = vsyncadd [#allocation4], 4294967040 }
 0x691   :  { %1285 = vsyncpa [#allocation3], 1 }
 0x692   :  { %1286 = vsyncpa [#allocation6], 1 }
 0x693   :  { %1287 = vsyncpa [#allocation9], 1 }
 0x694   :  { %1288 = vsyncpa [#allocation12], 1 }
 0x695   :  { %1289 = vsyncpa [#allocation4], 1 }

</bundles_post_ra>
